<compile_context>
chip_gen: v6e
topology: v6e:2x2x1
jax: 0.10.0
libtpu: 0.0.40
codegen_flags: <defaults>
</compile_context>

<pallas_src>
import jax
import jax.numpy as jnp
from jax.experimental import pallas as pl
from jax.experimental.pallas import tpu as pltpu


def attention_kernel(enc_ref, dec_ref, we_ref, wd_ref, bias_ref, wf_ref, out_ref):
    # enc_ref: (Bt, N, E)   dec_ref: (Bt, D)
    bt, n, e = enc_ref.shape
    a = we_ref.shape[1]

    enc = enc_ref[...]                                   # (Bt, N, E)
    enc2d = enc.reshape(bt * n, e)                       # (Bt*N, E)

    # encoder projection for all Bt*N rows in one MXU GEMM -> (Bt*N, A)
    att1 = jnp.dot(enc2d, we_ref[...], preferred_element_type=jnp.float32)
    att1 = att1.reshape(bt, n, a)                        # (Bt, N, A)

    # decoder projection, batched: (Bt, D) @ (D, A)
    att2 = jnp.dot(dec_ref[...], wd_ref[...], preferred_element_type=jnp.float32)

    # relu(att1 + att2.unsqueeze(1)) with the two biases folded into one add
    h = jnp.maximum(att1 + att2[:, None, :] + bias_ref[...], 0.0)   # (Bt, N, A)

    # scoring: VPU multiply + lane reduction (instead of a 1-column MXU matmul)
    # full_att's bias is omitted: a constant shift before softmax is a no-op.
    att = jnp.sum(h * wf_ref[0], axis=-1)                # (Bt, N), lane-major

    # softmax over the N (pixel) axis, N on the lane axis
    m = jnp.max(att, axis=-1, keepdims=True)
    ex = jnp.exp(att - m)
    denom = jnp.sum(ex, axis=-1, keepdims=True)
    # approx=False keeps the 1e-4 end-to-end tolerance; flip to approx=True
    # (EUP slot, effectively free) if that tolerance is not required.
    alpha = ex * pl.reciprocal(denom, approx=False)      # (Bt, N)

    # attention_weighted_encoding = sum_N alpha * encoder_out -> (Bt, E)
    awe = jnp.sum(enc.astype(jnp.float32) * alpha[:, :, None], axis=1)
    out_ref[...] = awe.astype(out_ref.dtype)


def attention_forward(encoder_out, decoder_hidden, params, *, block_b=8):
    """encoder_out: (B, N, E), decoder_hidden: (B, D) -> (B, E)."""
    we, be, wd, bd, wf, bf = params
    B, N, E = encoder_out.shape
    D = decoder_hidden.shape[1]
    A = we.shape[1]
    del bf  # constant shift before softmax: no effect on the returned encoding

    # Fold the encoder_att and decoder_att biases into a single vector.
    bias = (be + bd).reshape(1, A).astype(jnp.float32)
    wf_row = wf.reshape(1, A).astype(jnp.float32)

    # Batch tile: sublane-dense (>=8) whenever we actually tile the batch axis.
    bt = B if B <= block_b else block_b
    num_blocks = pl.cdiv(B, bt)
    Bp = num_blocks * bt
    if Bp != B:
        encoder_out = jnp.pad(encoder_out, ((0, Bp - B), (0, 0), (0, 0)))
        decoder_hidden = jnp.pad(decoder_hidden, ((0, Bp - B), (0, 0)))

    grid_spec = pltpu.PrefetchScalarGridSpec(
        num_scalar_prefetch=0,
        grid=(num_blocks,),
        in_specs=[
            pl.BlockSpec((bt, N, E), lambda b: (b, 0, 0)),   # encoder_out
            pl.BlockSpec((bt, D),    lambda b: (b, 0)),      # decoder_hidden
            pl.BlockSpec((E, A),     lambda b: (0, 0)),      # W_enc
            pl.BlockSpec((D, A),     lambda b: (0, 0)),      # W_dec
            pl.BlockSpec((1, A),     lambda b: (0, 0)),      # folded bias
            pl.BlockSpec((1, A),     lambda b: (0, 0)),      # W_full (as a row)
        ],
        out_specs=pl.BlockSpec((bt, E), lambda b: (b, 0)),
    )

    out = pl.pallas_call(
        attention_kernel,
        out_shape=jax.ShapeDtypeStruct((Bp, E), encoder_out.dtype),
        grid_spec=grid_spec,
        compiler_params=pltpu.CompilerParams(
            dimension_semantics=("parallel",)),
    )(encoder_out, decoder_hidden, we, wd, bias, wf_row)

    return out[:B] if Bp != B else out


def attention_reference(encoder_out, decoder_hidden, params):
    """Pure-JAX reference mirroring the PyTorch forward."""
    we, be, wd, bd, wf, bf = params
    att1 = encoder_out @ we + be                           # (B, N, A)
    att2 = decoder_hidden @ wd + bd                        # (B, A)
    h = jnp.maximum(att1 + att2[:, None, :], 0.0)          # (B, N, A)
    att = (h @ wf + bf)[..., 0]                            # (B, N)
    alpha = jax.nn.softmax(att, axis=1)                    # (B, N)
    return (encoder_out * alpha[:, :, None]).sum(axis=1)   # (B, E)


if __name__ == "__main__":
    B, N = 16, 16          # batch, num encoder positions (Bt*N = 128 rows/step)
    E, D, A = 32, 32, 32   # encoder_dim, decoder_dim, attention_dim

    key = jax.random.PRNGKey(0)
    keys = jax.random.split(key, 8)

    encoder_out    = jax.random.normal(keys[0], (B, N, E), jnp.float32)
    decoder_hidden = jax.random.normal(keys[1], (B, D), jnp.float32)

    # Deterministic synthetic parameters (Linear weights stored as (in, out)).
    we = jax.random.normal(keys[2], (E, A), jnp.float32) * 0.1
    be = jax.random.normal(keys[3], (1, A), jnp.float32) * 0.1
    wd = jax.random.normal(keys[4], (D, A), jnp.float32) * 0.1
    bd = jax.random.normal(keys[5], (1, A), jnp.float32) * 0.1
    wf = jax.random.normal(keys[6], (A, 1), jnp.float32) * 0.1
    bf = jax.random.normal(keys[7], (1, 1), jnp.float32) * 0.1
    params = (we, be, wd, bd, wf, bf)

    out = attention_forward(encoder_out, decoder_hidden, params, block_b=8)
    out = jax.block_until_ready(out)

    ref = attention_reference(encoder_out, decoder_hidden, params)
    assert out.shape == (B, E)
    assert jnp.allclose(out, ref, atol=1e-4, rtol=1e-4), "mismatch vs reference"

    print("KERNEL_OK")
</pallas_src>

<mosaic_0001>
module attributes {stable_mosaic.version = 11 : i64} {
  func.func @attention_kernel(%arg0: i32, %arg1: memref<8x16x32xf32, #tpu.memory_space<vmem>>, %arg2: memref<8x32xf32, #tpu.memory_space<vmem>>, %arg3: memref<32x32xf32, #tpu.memory_space<vmem>>, %arg4: memref<32x32xf32, #tpu.memory_space<vmem>>, %arg5: memref<1x32xf32, #tpu.memory_space<vmem>>, %arg6: memref<1x32xf32, #tpu.memory_space<vmem>>, %arg7: memref<8x32xf32, #tpu.memory_space<vmem>>) attributes {dimension_semantics = [#tpu.dimension_semantics<parallel>], iteration_bounds = array<i64: 2>, scalar_prefetch = 0 : i64, scratch_operands = 0 : i64, tpu.core_type = #tpu.core_type<tc>, window_params = [{transform_indices = @transform_0, window_bounds = array<i64: 8, 16, 32>}, {transform_indices = @transform_1, window_bounds = array<i64: 8, 32>}, {pipeline_mode = #tpu.pipeline_mode<synchronous>, transform_indices = @transform_2, window_bounds = array<i64: 32, 32>}, {pipeline_mode = #tpu.pipeline_mode<synchronous>, transform_indices = @transform_3, window_bounds = array<i64: 32, 32>}, {pipeline_mode = #tpu.pipeline_mode<synchronous>, transform_indices = @transform_4, window_bounds = array<i64: 1, 32>}, {pipeline_mode = #tpu.pipeline_mode<synchronous>, transform_indices = @transform_5, window_bounds = array<i64: 1, 32>}, {transform_indices = @transform_6, window_bounds = array<i64: 8, 32>}]} {
    %c0 = arith.constant 0 : index
    %c0_0 = arith.constant 0 : index
    %c0_1 = arith.constant 0 : index
    %0 = vector.load %arg1[%c0, %c0_0, %c0_1] : memref<8x16x32xf32, #tpu.memory_space<vmem>>, vector<8x16x32xf32>
    %1 = vector.shape_cast %0 : vector<8x16x32xf32> to vector<128x32xf32>
    %c0_2 = arith.constant 0 : index
    %c0_3 = arith.constant 0 : index
    %2 = vector.load %arg3[%c0_2, %c0_3] : memref<32x32xf32, #tpu.memory_space<vmem>>, vector<32x32xf32>
    %cst = arith.constant dense<0.000000e+00> : vector<128x32xf32>
    %3 = tpu.matmul %1, %2, %cst {dimension_numbers = #tpu.dot_dimension_numbers<[1], [0], [0], [1], [0, 0, 1, 1], [], []>} : vector<128x32xf32>, vector<32x32xf32>, vector<128x32xf32> -> vector<128x32xf32>
    %4 = vector.shape_cast %3 : vector<128x32xf32> to vector<8x16x32xf32>
    %c0_4 = arith.constant 0 : index
    %c0_5 = arith.constant 0 : index
    %5 = vector.load %arg2[%c0_4, %c0_5] : memref<8x32xf32, #tpu.memory_space<vmem>>, vector<8x32xf32>
    %c0_6 = arith.constant 0 : index
    %c0_7 = arith.constant 0 : index
    %6 = vector.load %arg4[%c0_6, %c0_7] : memref<32x32xf32, #tpu.memory_space<vmem>>, vector<32x32xf32>
    %cst_8 = arith.constant dense<0.000000e+00> : vector<8x32xf32>
    %7 = tpu.matmul %5, %6, %cst_8 {dimension_numbers = #tpu.dot_dimension_numbers<[1], [0], [0], [1], [0, 0, 1, 1], [], []>} : vector<8x32xf32>, vector<32x32xf32>, vector<8x32xf32> -> vector<8x32xf32>
    %8 = vector.shape_cast %7 : vector<8x32xf32> to vector<8x1x32xf32>
    %9 = vector.broadcast %8 : vector<8x1x32xf32> to vector<8x16x32xf32>
    %10 = arith.addf %4, %9 : vector<8x16x32xf32>
    %c0_9 = arith.constant 0 : index
    %c0_10 = arith.constant 0 : index
    %11 = vector.load %arg5[%c0_9, %c0_10] : memref<1x32xf32, #tpu.memory_space<vmem>>, vector<1x32xf32>
    %12 = vector.shape_cast %11 : vector<1x32xf32> to vector<1x1x32xf32>
    %13 = vector.broadcast %12 : vector<1x1x32xf32> to vector<8x16x32xf32>
    %14 = arith.addf %10, %13 : vector<8x16x32xf32>
    %cst_11 = arith.constant 0.000000e+00 : f32
    %15 = vector.broadcast %cst_11 : f32 to vector<8x16x32xf32>
    %16 = arith.maximumf %14, %15 : vector<8x16x32xf32>
    %c0_12 = arith.constant 0 : index
    %c0_13 = arith.constant 0 : index
    %17 = vector.load %arg6[%c0_12, %c0_13] : memref<1x32xf32, #tpu.memory_space<vmem>>, vector<1x32xf32>
    %18 = vector.shape_cast %17 : vector<1x32xf32> to vector<32xf32>
    %19 = vector.shape_cast %18 : vector<32xf32> to vector<1x1x32xf32>
    %20 = vector.broadcast %19 : vector<1x1x32xf32> to vector<8x16x32xf32>
    %21 = arith.mulf %16, %20 : vector<8x16x32xf32>
    %cst_14 = arith.constant dense<0.000000e+00> : vector<8x16xf32>
    %22 = vector.multi_reduction <add>, %21, %cst_14 [2] : vector<8x16x32xf32> to vector<8x16xf32>
    %cst_15 = arith.constant dense<0xFF800000> : vector<8xf32>
    %23 = vector.multi_reduction <maximumf>, %22, %cst_15 [1] : vector<8x16xf32> to vector<8xf32>
    %24 = vector.shape_cast %23 : vector<8xf32> to vector<8x1xf32>
    %25 = vector.broadcast %24 : vector<8x1xf32> to vector<8x16xf32>
    %26 = arith.subf %22, %25 : vector<8x16xf32>
    %27 = math.exp %26 : vector<8x16xf32>
    %cst_16 = arith.constant dense<0.000000e+00> : vector<8xf32>
    %28 = vector.multi_reduction <add>, %27, %cst_16 [1] : vector<8x16xf32> to vector<8xf32>
    %29 = vector.shape_cast %28 : vector<8xf32> to vector<8x1xf32>
    %30 = tpu.reciprocal %29 : vector<8x1xf32> -> vector<8x1xf32>
    %31 = vector.broadcast %30 : vector<8x1xf32> to vector<8x16xf32>
    %32 = arith.mulf %27, %31 : vector<8x16xf32>
    %33 = vector.shape_cast %32 : vector<8x16xf32> to vector<8x16x1xf32>
    %34 = vector.broadcast %33 : vector<8x16x1xf32> to vector<8x16x32xf32>
    %35 = arith.mulf %0, %34 : vector<8x16x32xf32>
    %cst_17 = arith.constant dense<0.000000e+00> : vector<8x32xf32>
    %36 = vector.multi_reduction <add>, %35, %cst_17 [1] : vector<8x16x32xf32> to vector<8x32xf32>
    %c0_18 = arith.constant 0 : index
    %c0_19 = arith.constant 0 : index
    %37 = vector.load %arg7[%c0_18, %c0_19] : memref<8x32xf32, #tpu.memory_space<vmem>>, vector<8x32xf32>
    tpu.vector_store %arg7[%c0_18, %c0_19], %36 {strides = array<i32>} : memref<8x32xf32, #tpu.memory_space<vmem>>, vector<8x32xf32>,
    return
  }
  func.func @transform_0(%arg0: i32) -> (i32, i32, i32) {
    %c0_i32 = arith.constant 0 : i32
    %c0_i32_0 = arith.constant 0 : i32
    %c0_i32_1 = arith.constant 0 : i32
    return %arg0, %c0_i32, %c0_i32_0 : i32, i32, i32
  }
  func.func @transform_1(%arg0: i32) -> (i32, i32) {
    %c0_i32 = arith.constant 0 : i32
    %c0_i32_0 = arith.constant 0 : i32
    return %arg0, %c0_i32 : i32, i32
  }
  func.func @transform_2(%arg0: i32) -> (i32, i32) {
    %c0_i32 = arith.constant 0 : i32
    %c0_i32_0 = arith.constant 0 : i32
    %c0_i32_1 = arith.constant 0 : i32
    return %c0_i32, %c0_i32_0 : i32, i32
  }
  func.func @transform_3(%arg0: i32) -> (i32, i32) {
    %c0_i32 = arith.constant 0 : i32
    %c0_i32_0 = arith.constant 0 : i32
    %c0_i32_1 = arith.constant 0 : i32
    return %c0_i32, %c0_i32_0 : i32, i32
  }
  func.func @transform_4(%arg0: i32) -> (i32, i32) {
    %c0_i32 = arith.constant 0 : i32
    %c0_i32_0 = arith.constant 0 : i32
    %c0_i32_1 = arith.constant 0 : i32
    return %c0_i32, %c0_i32_0 : i32, i32
  }
  func.func @transform_5(%arg0: i32) -> (i32, i32) {
    %c0_i32 = arith.constant 0 : i32
    %c0_i32_0 = arith.constant 0 : i32
    %c0_i32_1 = arith.constant 0 : i32
    return %c0_i32, %c0_i32_0 : i32, i32
  }
  func.func @transform_6(%arg0: i32) -> (i32, i32) {
    %c0_i32 = arith.constant 0 : i32
    %c0_i32_0 = arith.constant 0 : i32
    return %arg0, %c0_i32 : i32, i32
  }
}

</mosaic_0001>

<bundles_post_ra>
// kernel: tpu_custom_call.1
= control target key start
LH: loop header
LB: loop body
LE: loop exit
PB: predicated region body
PF: predicated region fallthrough
CT: control target
= control target key end

     0   :  { %s2725_s0 = inlined_call_operand.hbm [shape: f32[16,16,32], index: 0, kind: input, shape index: {}]   ;;  %s2726_s1 = inlined_call_operand.hbm [shape: f32[16,32], index: 1, kind: input, shape index: {}]   ;;  %s2727_s2 = inlined_call_operand.hbm [shape: f32[32,32], index: 2, kind: input, shape index: {}]   ;;  %s2728_s3 = inlined_call_operand.hbm [shape: f32[32,32], index: 3, kind: input, shape index: {}]   ;;  %s2729_s4 = inlined_call_operand.vmem [shape: f32[1,32], index: 4, kind: input, shape index: {}]   ;;  %s2730_s5 = inlined_call_operand.vmem [shape: f32[1,32], index: 5, kind: input, shape index: {}]   ;;  %s2731_s6 = inlined_call_operand.hbm [shape: f32[16,32], index: 6, kind: output, shape index: {}]  }
   0x1   :  { %2741 = sst [smem:[#allocation17_spill]] %s2725_s0 }
   0x2   :  { %2742 = sst [smem:[#allocation18_spill]] %s2727_s2 }
   0x3   :  { %2743 = sst [smem:[#allocation19_spill]] %s2728_s3 }
   0x4   :  { %11 = vsyncpa [#allocation3], 0 }
   0x5   :  { %13 = vsyncpa [#allocation3 + $0x1], 0 }
   0x6   :  { %14 = vsyncpa [#allocation6], 0 }
   0x7   :  { %16 = vsyncpa [#allocation6 + $0x1], 0 }
   0x8   :  { %17 = vsyncpa [#allocation9], 0 }
   0x9   :  { %18 = vsyncpa [#allocation4], 0 }
   0xa   :  { %20 = vsyncpa [#allocation4 + $0x1], 0  ;;  %s2026_s21 = smov 0   ;;  %s2028_s22 = smov 0  }
   0xb   :  { %s2030_s23 = smov 0   ;;  %s2032_s24 = smov 0  }
   0xc LB: > { %s2047_s25 = sadd.s32 4294967295, %s1978_s24   ;;  %s1562_s26 = sadd.s32 4294967294, %s1978_s24   ;;  %s1978_s24 = sphi %s2032_s24, %s2774_s24   ;;  %s1974_s23 = sphi %s2030_s23, %s2773_s23   ;;  %s1970_s22 = sphi %s2028_s22, %s2772_s22   ;;  %s1966_s21 = sphi %s2026_s21, %s2771_s21  }
   0xd   : > { %p46_p0 = scmp.ne.s32.totalorder %s1970_s22, %s1966_s21  ;;  %p2734_p1 = scmp.eq.s32.totalorder %s2047_s25, 0 }
   0xe   : > { %p180_p2 = scmp.eq.s32.totalorder %s2047_s25, 1  ;;  %p186_p3 = scmp.eq.s32.totalorder %s1562_s26, 1 }
   0xf   : > { %p2056_p4 = por %p2734_p1, %p46_p0  ;;  %p1563_p5 = scmp.ge.s32.totalorder %s1978_s24, 1 }
  0x10   : > { %p2061_p6 = por %p186_p3, %p46_p0  ;;  %p193_p7 = scmp.lt.s32.totalorder %s1978_s24, 3 }
  0x11   : > { %s2744_s27 = scalar_select %p2056_p4, 1, 0 }
  0x12   : > { %s2745_s28 = scalar_select %p2061_p6, 1, 0 }
  0x13   : > { %p2066_p8 = pnand %p1563_p5, %p193_p7  ;;  %s1980_s30 = smov [#allocation7]  }
  0x14   : > { %s205_s7 = sshll.u32 %s1980_s30, 4  ;;  %s1981_s9 = smov [#allocation8]   ;;  %s206_s7 = int_to_ptr.vmem [resolvable:$true] %s205_s7 }
  0x15   : > { %s2746_s29 = scalar_select %p2066_p8, 1, 0 }
  0x16   : > { %p1694_p9 = pneg %p2066_p8  ;;  %s218_s10 = sshll.u32 %s1981_s9, 4  ;;  %s219_s10 = int_to_ptr.vmem [resolvable:$true] %s218_s10 }
  0x17   : > { %s1805_s11 = scalar_lea.vmem %s206_s7, 512  ;;  %p1813_p5 = scmp.lt.s32.totalorder %s206_s7, %s206_s7 }
  0x18   : > { %p2075_p11 = pnand %p1694_p9, %p2734_p1  ;;  %p1806_p13 = scmp.ne.s32.totalorder %s206_s7, %s1805_s11 }
  0x19   : > { %p1814_p7 = scmp.lt.s32.totalorder %s1805_s11, %s1805_s11 }
  0x1a   : > { %p1796_p12 = pneg %p2075_p11 }
  0x1b   : > { %p1815_p10 = por %p1814_p7, %p1813_p5 }
  0x1c   : > { %p1808_p0 = pnand %p1806_p13, %p1796_p12 }
  0x1e   : > { %p1809_p3 = pneg %p1808_p0 }
  0x20   : > { %p1816_p9 = pnand %p1815_p10, %p1809_p3 }
  0x22   : > { %1819 = shalt.err (!%p1816_p9)
}
  0x23   : > { %s2732_s12 = smov 128   ;;  %s2733_s13 = smov 8  }
  0x24   : > { %s2748_s2 = sld [smem:[#allocation18_spill]]  ;;  %s1831_s16 = scalar_lea.vmem %s219_s10, 512 }
  0x25   : > { %p1832_p13 = scmp.ne.s32.totalorder %s219_s10, %s1831_s16  ;;  %p1839_p10 = scmp.lt.s32.totalorder %s219_s10, %s219_s10 }
  0x26   : > { %p1840_p3 = scmp.lt.s32.totalorder %s1831_s16, %s1831_s16 }
  0x27   : > { %p1834_p0 = pnand %p1832_p13, %p1796_p12 }
  0x28   : > { %p1841_p7 = por %p1840_p3, %p1839_p10 }
  0x29   : > { %p1835_p5 = pneg %p1834_p0 }
  0x2a   : > { %1697 = dma.hbm_to_vmem [thread:$0]  (!%p2075_p11), %s2748_s2, 512, %s206_s7, [#allocation6], %s2732_s12, %s2732_s12, %s2733_s13  }
  0x2b   : > { %p1842_p9 = pnand %p1841_p7, %p1835_p5 }
  0x2d   : > { %1845 = shalt.err (!%p1842_p9)
}
  0x2e   : > { %s2749_s3 = sld [smem:[#allocation19_spill]]  ;;  %s2104_s19 = sadd.s32 1, %s1978_s24  }
  0x2f   : > { %s33_s20 = sadd.s32 1, %s1974_s23  ;;  %s30_s26 = ssub.s32 %s1978_s24, %s2104_s19 }
  0x30   : > { %p40_p12 = scmp.ne.s32.totalorder %s1974_s23, %s1970_s22  ;;  %p31_p13 = scmp.eq.s32.totalorder %s30_s26, 0 }
  0x31   : > { %p41_p0 = scmp.eq.s32.totalorder %s1978_s24, 0  ;;  %p1714_p10 = scmp.lt.s32.totalorder %s1978_s24, 2 }
  0x32   : > { %p2114_p5 = por %p180_p2, %p40_p12  ;;  %s2123_s8 = sand.u32 1, %s1974_s23  }
  0x33   : > { %s2120_s7 = scalar_select %p31_p13, %s1974_s23, %s33_s20  }
  0x34   : > { %1700 = dma.hbm_to_vmem [thread:$0]  (!%p2075_p11), %s2749_s3, 512, %s219_s10, [#allocation9], %s2732_s12, %s2732_s12, %s2733_s13  }
  0x35   : > { %s2750_s30 = scalar_select %p2114_p5, 1, 0 }
  0x36   : > { %2751 = sst [smem:[#allocation16_spill]] %s2120_s7  ;;  %p42_p3 = por %p41_p0, %p40_p12 }
  0x37   : > { %s1567_s9 = sshll.u32 %s2123_s8, 7  ;;  %s1603_s10 = sshll.u32 %s1978_s24, 11 }
  0x38   : > { %s2752_s0 = sld [smem:[#allocation17_spill]]  ;;  %s242_s16 = scalar_lea.vmem [#allocation2], %s1567_s9 }
  0x39   : > { %s250_s17 = sshll.u32 %s242_s16, 4  ;;  %p2134_p2 = pnand %p1714_p10, %p42_p3  ;;  %s2132_s17 = int_to_ptr.vmem [resolvable:$true] %s250_s17 }
  0x3a   : > { %s239_s12 = scalar_lea.sflag [#allocation3], %s2123_s8 }
  0x3b   : > { %p1848_p7 = pneg %p2134_p2 }
  0x3e   : > { %s2130_s15 = scalar_lea.hbm %s2752_s0, %s1603_s10  ;;  %s1851_s11 = scalar_lea.hbm %s2752_s0, 4096 }
  0x3f   : > { %s1846_s13 = scalar_lea.hbm %s2130_s15, 2048  ;;  %p1852_p13 = scmp.lt.s32.totalorder %s2130_s15, %s2752_s0 }
  0x40   : > { %p1847_p11 = scmp.ne.s32.totalorder %s2130_s15, %s1846_s13  ;;  %p1853_p0 = scmp.lt.s32.totalorder %s1851_s11, %s1846_s13 }
  0x42   : > { %p1849_p9 = pnand %p1848_p7, %p1847_p11  ;;  %p1854_p10 = por %p1853_p0, %p1852_p13 }
  0x44   : > { %p1850_p12 = pneg %p1849_p9 }
  0x46   : > { %p1855_p3 = pnand %p1854_p10, %p1850_p12 }
  0x48   : > { %1858 = shalt.err (!%p1855_p3)
}
  0x49   : > { %s1859_s20 = scalar_lea.vmem %s2132_s17, 2048  ;;  %s1984_s9 = smov [#allocation2]  }
  0x4a   : > { %p1860_p1 = scmp.ne.s32.totalorder %s2132_s17, %s1859_s20  ;;  %s1864_s10 = sshll.u32 %s1984_s9, 4  ;;  %s1865_s10 = int_to_ptr.vmem [resolvable:$false] %s1864_s10 }
  0x4b   : > { %s1866_s26 = scalar_lea.vmem %s1865_s10, 4096  ;;  %p1867_p6 = scmp.lt.s32.totalorder %s2132_s17, %s1865_s10 }
  0x4c   : > { %p1862_p11 = pnand %p1860_p1, %p1848_p7  ;;  %p1868_p5 = scmp.lt.s32.totalorder %s1866_s26, %s1859_s20 }
  0x4e   : > { %p1863_p9 = pneg %p1862_p11  ;;  %p1869_p4 = por %p1868_p5, %p1867_p6 }
  0x50   : > { %p1870_p13 = pnand %p1869_p4, %p1863_p9 }
  0x52   : > { %1873 = shalt.err (!%p1870_p13)
}
  0x53   : > { %s2754_s13 = smov 8   ;;  %s2755_s11 = smov 128  }
  0x54   : > { %1704 = dma.hbm_to_vmem [thread:$0]  (!%p2134_p2), %s2130_s15, 2048, %s2132_s17, %s239_s12, %s2755_s11, %s2755_s11, %s2754_s13  }
  0x55   : > { %s1572_s14 = sshll.u32 %s1978_s24, 7  ;;  %s2756_s9 = sshll.u32 %s2123_s8, 3 }
  0x56   : > { %s2174_s26 = scalar_lea.hbm %s2726_s1, %s1572_s14  ;;  %s264_s10 = scalar_lea.vmem [#allocation5], %s2756_s9 }
  0x57   : > { %s271_s0 = sshll.u32 %s264_s10, 4  ;;  %s2757_s2 = sand.u32 1, %s1978_s24   ;;  %s272_s0 = int_to_ptr.vmem [resolvable:$true] %s271_s0 }
  0x58   : > { %s261_s3 = scalar_lea.sflag [#allocation6], %s2757_s2  ;;  %s1874_s7 = scalar_lea.hbm %s2174_s26, 128 }
  0x59   : > { %p1875_p1 = scmp.ne.s32.totalorder %s2174_s26, %s1874_s7  ;;  %s1879_s17 = scalar_lea.hbm %s2726_s1, 256 }
  0x5a   : > { %p1880_p5 = scmp.lt.s32.totalorder %s2174_s26, %s2726_s1  ;;  %p1881_p12 = scmp.lt.s32.totalorder %s1879_s17, %s1874_s7 }
  0x5b   : > { %p1877_p4 = pnand %p1875_p1, %p1848_p7 }
  0x5c   : > { %p1882_p0 = por %p1881_p12, %p1880_p5 }
  0x5d   : > { %p1878_p6 = pneg %p1877_p4 }
  0x5f   : > { %p1883_p10 = pnand %p1882_p0, %p1878_p6 }
  0x61   : > { %1886 = shalt.err (!%p1883_p10)
}
  0x62   : > { %s1887_s11 = scalar_lea.vmem %s272_s0, 128  ;;  %s1985_s2 = smov [#allocation5]  }
  0x63   : > { %p1888_p3 = scmp.ne.s32.totalorder %s272_s0, %s1887_s11  ;;  %s1892_s14 = sshll.u32 %s1985_s2, 4  ;;  %s1893_s14 = int_to_ptr.vmem [resolvable:$false] %s1892_s14 }
  0x64   : > { %s1894_s16 = scalar_lea.vmem %s1893_s14, 256  ;;  %p1895_p13 = scmp.lt.s32.totalorder %s272_s0, %s1893_s14 }
  0x65   : > { %p1890_p11 = pnand %p1888_p3, %p1848_p7  ;;  %p1896_p1 = scmp.lt.s32.totalorder %s1894_s16, %s1887_s11 }
  0x67   : > { %p1891_p9 = pneg %p1890_p11  ;;  %p1897_p4 = por %p1896_p1, %p1895_p13 }
  0x69   : > { %p1898_p8 = pnand %p1897_p4, %p1891_p9 }
  0x6b   : > { %1901 = shalt.err (!%p1898_p8)
}
  0x6c   : > { %1707 = dma.hbm_to_vmem [thread:$0]  (!%p2134_p2), %s2174_s26, 128, %s272_s0, %s261_s3  }
  0x6d   : > { %p2758_p6 = scmp.ne.s32.totalorder %s2746_s29, 0 }
  0x6e   : > { %s2201_s7 = sand.u32 (!%p2758_p6), 1, %s1970_s22   ;;  %p2759_p7 = scmp.ne.s32.totalorder (!%p2758_p6), %s2744_s27, 0 }
  0x6f   : > { %280 = sbr.rel (%p2758_p6) target bundleno = 1223 (0x4c7), region = 44  ;;  %s1574_s20 = sshll.u32 (!%p2758_p6), %s2201_s7, 7 }
  0x70   : > { %s283_s9 = scalar_lea.sflag (!%p2758_p6), [#allocation3], %s2201_s7  ;;  %s2205_s10 = scalar_lea.vmem (!%p2758_p6), [#allocation2], %s1574_s20 }
  0x74   : > { %1945 = dma.done.wait (%p2759_p7), %s283_s9, 2048  }
  0x75   : > { %1947 = vsyncadd (%p2759_p7), %s283_s9, 4294965248  ;;  %s291_s0 = sand.u32 1, %s2047_s25   ;;  %s1575_s3 = sshll.u32 %s2201_s7, 3 }
  0x76   : > { %s292_s29 = scalar_lea.sflag [#allocation6], %s291_s0  ;;  %s2215_s18 = scalar_lea.vmem [#allocation5], %s1575_s3 }
  0x77   : > { %1949 = dma.done.wait (%p2759_p7), %s292_s29, 128  }
  0x78   : > { %1951 = vsyncadd (%p2759_p7), %s292_s29, 4294967168  ;;  %p2760_p8 = scmp.eq.s32.totalorder %s2047_s25, 0 }
  0x7a   : > { %1953 = dma.done.wait (%p2760_p8), [#allocation6], 512   ;;  %p2761_p2 = pmov %p2760_p8 }
  0x7c   : > { %1955 = vsyncadd (%p2761_p2), [#allocation6], 4294966784  ;;  %p2762_p5 = pmov %p2761_p2 }
  0x7d   : > { %p2763_p12 = pmov %p2761_p2 }
  0x7e   : > { %1957 = dma.done.wait (%p2762_p5), [#allocation9], 512  }
  0x7f   : > { %1959 = vsyncadd (%p2763_p12), [#allocation9], 4294966784  ;;  %v357_v0 = vld [vmem:[#allocation7 + $0x18] sm:$0xff]  ;;  %v356_v1 = vld [vmem:[#allocation7 + $0x10] sm:$0xff]  ;;  %vm358_vm0 = vcmask 261120   ;;  %v1986_v9 = vmov 0.0   ;;  %v635_v29 = vlaneseq }
  0x80   : > { %1672 = vmatprep.subr.mxu1 %v357_v0  ;;  %1629 = vmatprep.subr.mxu0 %v357_v0  ;;  %v355_v2 = vld [vmem:[#allocation7 + $0x8] sm:$0xff]  ;;  %v2230_v3 = vld [vmem:[%s2205_s10 + $0x50] sm:$0xff]  ;;  %v556_v6 = vld [vmem:[#allocation8 + $0x18] sm:$0xff]  ;;  %vm1987_vm1 = vmmov 0   ;;  %v1988_v27 = vmov 1966171168  }
  0x81   : > { %1676 = vmatpush3.msra.mxu1 %v357_v0  ;;  %1630 = vmatpush3.msra.mxu0 %v357_v0  ;;  %v354_v4 = vld [vmem:[#allocation7] sm:$0xff]  ;;  %v2235_v5 = vld [vmem:[%s2205_s10 + $0x58] sm:$0xff]  ;;  %v2238_v7 = vld [vmem:[%s2205_s10] sm:$0xff]  ;;  %v633_v28 = vunpack.c.l.s4 %v1988_v27  ;;  %v2318_v35 = vshrl.u32 %v635_v29, 7  ;;  %vm873_vm2 = vcmask 130112   ;;  %vm938_vm3 = vcmask 1041409  }
  0x82   : > { %1673 = vmatprep.subr.mxu1 %v356_v1  ;;  %1631 = vmatprep.subr.mxu0 %v356_v1  ;;  %v2241_v8 = vld [vmem:[%s2205_s10 + $0x60] sm:$0xff]  ;;  %v2246_v10 = vld [vmem:[%s2205_s10 + $0x8] sm:$0xff]  ;;  %v2252_v12 = vld [vmem:[%s2205_s10 + $0x10] sm:$0xff]  ;;  %vm940_vm4 = vcmask 1042434   ;;  %vm942_vm5 = vcmask 1043459   ;;  %vm944_vm6 = vcmask 1044484  }
  0x83   : > { %1677 = vmatpush3.msra.mxu1 %v356_v1  ;;  %1632 = vmatpush3.msra.mxu0 %v356_v1  ;;  %v2249_v11 = vld [vmem:[%s2205_s10 + $0x68] sm:$0xff]  ;;  %v555_v13 = vld [vmem:[#allocation8 + $0x10] sm:$0xff]  ;;  %v2259_v14 = vld [vmem:[%s2205_s10 + $0x70] sm:$0xff]  ;;  %v634_v34 = vunpack.c.0.s8 %v633_v28  ;;  %v2328_v46 = vsub.s32 0, %v2318_v35  ;;  %vm946_vm7 = vcmask 1045509   ;;  %vm948_vm8 = vcmask 1046534  }
  0x84   : > { %1674 = vmatprep.subr.mxu1 %v355_v2  ;;  %1633 = vmatprep.subr.mxu0 %v355_v2  ;;  %v2268_v15 = vld [vmem:[%s2205_s10 + $0x18] sm:$0xff]  ;;  %v2276_v18 = vld [vmem:[%s2205_s10 + $0x20] sm:$0xff]  ;;  %v553_v19 = vld [vmem:[#allocation8] sm:$0xff]  ;;  %vm950_vm9 = vcmask 1047559   ;;  %vm953_vm10 = vcmask 130048   ;;  %s1599_s17 = sshll.u32 %s2047_s25, 7 }
  0x85   : > { %1678 = vmatpush3.msra.mxu1 %v355_v2  ;;  %1652 = vmatprep.mubr.msk.f32.mxu1 %vm358_vm0, %v2230_v3  ;;  %v554_v16 = vld [vmem:[#allocation8 + $0x8] sm:$0xff]  ;;  %v2283_v20 = vld [vmem:[%s2205_s10 + $0x28] sm:$0xff]  ;;  %v2289_v22 = vld [vmem:[%s2205_s10 + $0x30] sm:$0xff]  ;;  %v637_v40 = vsub.s32 %v634_v34, %v2318_v35  ;;  %s336_s13 = scalar_lea.vmem [#allocation10], %s1575_s3  ;;  %s2686_s14 = scalar_lea.hbm %s2731_s6, %s1599_s17 }
  0x86   : > { %1675 = vmatprep.subr.mxu1 %v354_v4  ;;  %1634 = vmatpush3.msra.mxu0 %v355_v2  ;;  %v2273_v17 = vld [vmem:[%s2205_s10 + $0x78] sm:$0xff]  ;;  %v552_v21 = vld [vmem:[%s2215_s18] sm:$0xff]  ;;  %s1450_s8 = sshll.u32 %s336_s13, 4  ;;  %s1437_s25 = scalar_lea.sflag [#allocation4], %s2201_s7  ;;  %s1451_s8 = int_to_ptr.vmem [resolvable:$true] %s1450_s8 }
  0x87   : > { %1679 = vmatpush3.msra.mxu1 %v354_v4  ;;  %1635 = vmatprep.subr.mxu0 %v354_v4  ;;  %v2297_v23 = vld [vmem:[%s2205_s10 + $0x38] sm:$0xff]  ;;  %v2300_v24 = vld [vmem:[%s2205_s10 + $0x40] sm:$0xff]  ;;  %v2307_v25 = vld [vmem:[%s2205_s10 + $0x48] sm:$0xff]  ;;  %s1902_s16 = scalar_lea.vmem %s1451_s8, 128  ;;  %p2767_p10 = scmp.ne.s32.totalorder %s2750_s30, 0 }
  0x88   : > { %1653 = vmatmul.mubr.msk.f32.vlgmr.msra.gmra.mxu1 %vm358_vm0, %v2235_v5  ;;  %1661 = vmatprep.subr.mxu1 %v1986_v9  ;;  %v2336_v60 = vld [vmem:[%s2729_s4] ss:$0 sm:$0xff]  ;;  %p1903_p0 = scmp.ne.s32.totalorder %s1451_s8, %s1902_s16  ;;  %s1990_s20 = smov [#allocation10]  }
  0x89   : > { %1662 = vmatpush3.msra.mxu1 %v556_v6  ;;  %1636 = vmatpush3.msra.mxu0 %v354_v4  ;;  %s1906_s9 = sshll.u32 %s1990_s20, 4  ;;  %s1907_s9 = int_to_ptr.vmem [resolvable:$false] %s1906_s9 }
  0x8a   : > { %1637 = vmatprep.mubr.msk.f32.mxu0 %vm358_vm0, %v2238_v7  ;;  %1655 = vmatprep.mubr.msk.f32.mxu1 %vm358_vm0, %v2241_v8  ;;  %p1904_p3 = pnand %p1903_p0, %p2767_p10  ;;  %s1908_s10 = scalar_lea.vmem %s1907_s9, 256 }
  0x8b   : > { %1638 = vmatmul.mubr.msk.f32.vlgmr.msra.gmra.mxu0 %vm358_vm0, %v2246_v10  ;;  %1663 = vmatprep.subr.mxu1 %v1986_v9  ;;  %p1909_p9 = scmp.lt.s32.totalorder %s1451_s8, %s1907_s9  ;;  %p1910_p13 = scmp.lt.s32.totalorder %s1908_s10, %s1902_s16 }
  0x8c   : > { %1656 = vmatmul.mubr.msk.f32.gmra.mxu1 %vm358_vm0, %v2249_v11  ;;  %1640 = vmatprep.mubr.msk.f32.mxu0 %vm358_vm0, %v2252_v12  ;;  %p1905_p11 = pneg %p1904_p3 }
  0x8d   : > { %1664 = vmatpush3.msra.mxu1 %v555_v13  ;;  %1658 = vmatprep.mubr.msk.f32.mxu1 %vm358_vm0, %v2259_v14  ;;  %p1911_p1 = por %p1910_p13, %p1909_p9 }
  0x8e   : > { %1665 = vmatprep.subr.mxu1 %v1986_v9 }
  0x8f   : > { %1641 = vmatmul.mubr.msk.f32.gmra.mxu0 %vm358_vm0, %v2268_v15  ;;  %1666 = vmatpush3.msra.mxu1 %v554_v16  ;;  %p1912_p4 = pnand %p1911_p1, %p1905_p11 }
  0x90   : > { %1659 = vmatmul.mubr.msk.f32.gmra.mxu1 %vm358_vm0, %v2273_v17  ;;  %1667 = vmatprep.subr.mxu1 %v1986_v9 }
  0x91   : > { %1643 = vmatprep.mubr.msk.f32.mxu0 %vm358_vm0, %v2276_v18  ;;  %1668 = vmatpush3.msra.mxu1 %v553_v19  ;;  %v2344_v19 = vld [vmem:[%s2730_s5] ss:$0 sm:$0xff] }
  0x92   : > { %1669 = vmatprep.mubr.msk.f32.mxu1 %vm1987_vm1, %v1986_v9 }
  0x93   : > { %1644 = vmatmul.mubr.msk.f32.gmra.mxu0 %vm358_vm0, %v2283_v20 }
  0x94   : > { %1670 = vmatmul.mubr.msk.f32.vlgmr.msra.gmra.mxu1 %vm358_vm0, %v552_v21  ;;  %1646 = vmatprep.mubr.msk.f32.mxu0 %vm358_vm0, %v2289_v22 }
  0x97   : > { %1647 = vmatmul.mubr.msk.f32.gmra.mxu0 %vm358_vm0, %v2297_v23 }
  0x98   : > { %1649 = vmatprep.mubr.msk.f32.mxu0 %vm358_vm0, %v2300_v24 }
  0x9b   : > { %1650 = vmatmul.mubr.msk.f32.gmra.mxu0 %vm358_vm0, %v2307_v25 }
 0x148   : > { %v2311_v26 = vpop.f32.mrf.mxu1 }
 0x14a   : > { %v2313_v30 = vpop.f32.mrf.mxu1 }
 0x14b   : > { %v1639_v31 = vpop.f32.mrf.mxu0 }
 0x14c   : > { %v2315_v32 = vpop.f32.mrf.mxu1 }
 0x14d   : > { %v473_v33 = vpop.f32.mrf.mxu0 }
 0x14e   : > { %v2320_v36 = vpop.f32.mrf.mxu1 }
 0x14f   : > { %v1642_v37 = vpop.f32.mrf.mxu0 }
 0x150   : > { %v2322_v38 = vpop.f32.mrf.mxu1 }
 0x151   : > { %v483_v39 = vpop.f32.mrf.mxu0 }
 0x152   : > { %v2325_v41 = vpop.f32.mrf.mxu1 }
 0x153   : > { %v1645_v42 = vpop.f32.mrf.mxu0 }
 0x154   : > { %v626_v43 = vpop.f32.mrf.mxu1 }
 0x155   : > { %v631_v44 = vcombine.high %v626_v43, %v626_v43  ;;  %v638_v45 = vrot.slane %v626_v43, %v637_v40  ;;  %v493_v47 = vpop.f32.mrf.mxu0 }
 0x156   : > { %v1671_v48 = vpop.f32.mrf.mxu1 }
 0x157   : > { %v645_v49 = vrot.slane %v631_v44, %v637_v40  ;;  %v646_v50 = vcombine.high %v638_v45, %v638_v45  ;;  %v654_v51 = vrot.slane %v638_v45, %v637_v40  ;;  %v1648_v52 = vpop.f32.mrf.mxu0 }
 0x159   : > { %v668_v53 = vrot.slane %v646_v50, %v637_v40  ;;  %v683_v54 = vrot.slane %v654_v51, %v2328_v46  ;;  %v676_v55 = vcombine.high %v654_v51, %v654_v51  ;;  %v503_v56 = vpop.f32.mrf.mxu0  ;;  %v661_v57 = vrot.slane %v645_v49, %v637_v40 }
 0x15a   : > { %v647_v2 = vcombine.high %v645_v49, %v645_v49 }
 0x15b   : > { %v687_v58 = vrot.slane %v668_v53, %v2328_v46  ;;  %v691_v59 = vrot.slane %v676_v55, %v2328_v46  ;;  %v678_v61 = vcombine.high %v668_v53, %v668_v53  ;;  %v1651_v62 = vpop.f32.mrf.mxu0  ;;  %v699_v63 = vrot.slane %v661_v57, %v2328_v46 }
 0x15c   : > { %v720_v0 = vadd.f32 %v683_v54, %v473_v33  ;;  %v721_v1 = vadd.f32 %v1639_v31, %v683_v54  ;;  %v675_v33 = vrot.slane %v647_v2, %v637_v40  ;;  %v677_v49 = vcombine.high %v661_v57, %v661_v57 }
 0x15d   : > { %v724_v4 = vadd.f32 %v691_v59, %v493_v47  ;;  %v513_v6 = vpop.f32.mrf.mxu0  ;;  %v695_v9 = vrot.slane %v678_v61, %v2328_v46  ;;  %v722_v21 = vadd.f32 %v687_v58, %v483_v39  ;;  %v725_v27 = vadd.f32 %v1645_v42, %v691_v59 }
 0x15e   : > { %v743_v13 = vadd.f32 %v2336_v60, %v720_v0  ;;  %v728_v16 = vadd.f32 %v699_v63, %v513_v6  ;;  %v744_v31 = vadd.f32 %v2336_v60, %v721_v1  ;;  %v729_v45 = vadd.f32 %v1651_v62, %v699_v63 }
 0x15f   : > { %v747_v28 = vadd.f32 %v2336_v60, %v724_v4  ;;  %v745_v43 = vadd.f32 %v2336_v60, %v722_v21  ;;  %v726_v44 = vadd.f32 %v695_v9, %v503_v56  ;;  %v723_v53 = vadd.f32 %v1642_v37, %v687_v58 }
 0x160   : > { %v759_v34 = vmax.f32 %v743_v13, 0.0  ;;  %v760_v48 = vmax.f32 %v744_v31, 0.0  ;;  %v751_v50 = vadd.f32 %v2336_v60, %v728_v16  ;;  %v748_v55 = vadd.f32 %v2336_v60, %v725_v27 }
 0x161   : > { %v761_v51 = vmax.f32 %v745_v43, 0.0  ;;  %v763_v39 = vmax.f32 %v747_v28, 0.0  ;;  %v746_v56 = vadd.f32 %v2336_v60, %v723_v53  ;;  %v679_v59 = vcombine.high %v675_v33, %v675_v33 }
 0x162   : > { %v782_v47 = vmul.f32 %v2344_v19, %v759_v34  ;;  %v783_v54 = vmul.f32 %v2344_v19, %v760_v48  ;;  %v727_v61 = vadd.f32 %v1648_v52, %v695_v9  ;;  %v749_v57 = vadd.f32 %v2336_v60, %v726_v44 }
 0x163   : > { %v784_v40 = vmul.f32 %v2344_v19, %v761_v51  ;;  %v752_v62 = vadd.f32 %v2336_v60, %v729_v45  ;;  %v767_v63 = vmax.f32 %v751_v50, 0.0  ;;  %v762_v58 = vmax.f32 %v746_v56, 0.0 }
 0x164   : > { %v798_v42 = vsel %vm358_vm0, %v782_v47, 0.0  ;;  %v764_v0 = vmax.f32 %v748_v55, 0.0  ;;  %v707_v1 = vrot.slane %v677_v49, %v2328_v46  ;;  %v801_v2 = vsel %vm358_vm0, %v783_v54, 0.0 }
 0x165   : > { %799 = vadd.xlane.f32.xlu0 %v798_v42  ;;  %v804_v37 = vsel %vm358_vm0, %v784_v40, 0.0  ;;  %v786_v4 = vmul.f32 %v2344_v19, %v763_v39  ;;  %v703_v6 = vrot.slane %v675_v33, %v2328_v46  ;;  %v785_v52 = vmul.f32 %v2344_v19, %v762_v58 }
 0x166   : > { %805 = vadd.xlane.f32.xlu1 %v804_v37  ;;  %v750_v9 = vadd.f32 %v2336_v60, %v727_v61  ;;  %v765_v13 = vmax.f32 %v749_v57, 0.0  ;;  %v768_v16 = vmax.f32 %v752_v62, 0.0  ;;  %v787_v28 = vmul.f32 %v2344_v19, %v764_v0 }
 0x167   : > { %v730_v21 = vadd.f32 %v703_v6, %v2313_v30  ;;  %v807_v27 = vsel %vm358_vm0, %v785_v52, 0.0  ;;  %v790_v34 = vmul.f32 %v2344_v19, %v767_v63  ;;  %v731_v31 = vadd.f32 %v2311_v26, %v703_v6 }
 0x168   : > { %v810_v33 = vsel %vm358_vm0, %v786_v4, 0.0  ;;  %v732_v44 = vadd.f32 %v707_v1, %v2320_v36  ;;  %v711_v45 = vrot.slane %v679_v59, %v2328_v46  ;;  %v766_v47 = vmax.f32 %v750_v9, 0.0 }
 0x169   : > { %802 = vadd.xlane.f32.xlu0 %v801_v2  ;;  %v753_v43 = vadd.f32 %v2336_v60, %v730_v21  ;;  %v791_v30 = vmul.f32 %v2344_v19, %v768_v16  ;;  %v813_v48 = vsel %vm358_vm0, %v787_v28, 0.0  ;;  %v788_v49 = vmul.f32 %v2344_v19, %v765_v13 }
 0x16a   : > { %808 = vadd.xlane.f32.xlu1 %v807_v27  ;;  %v754_v50 = vadd.f32 %v2336_v60, %v731_v31  ;;  %v733_v26 = vadd.f32 %v2315_v32, %v707_v1  ;;  %v822_v51 = vsel %vm358_vm0, %v790_v34, 0.0  ;;  %v755_v36 = vadd.f32 %v2336_v60, %v732_v44 }
 0x16b   : > { %v769_v53 = vmax.f32 %v753_v43, 0.0  ;;  %v734_v39 = vadd.f32 %v711_v45, %v2325_v41  ;;  %v825_v42 = vsel %vm358_vm0, %v791_v30, 0.0  ;;  %v789_v54 = vmul.f32 %v2344_v19, %v766_v47 }
 0x16c   : > { %v770_v55 = vmax.f32 %v754_v50, 0.0  ;;  %v756_v40 = vadd.f32 %v2336_v60, %v733_v26  ;;  %v735_v56 = vadd.f32 %v2322_v38, %v711_v45  ;;  %v816_v32 = vsel %vm358_vm0, %v788_v49, 0.0 }
 0x16d   : > { %811 = vadd.xlane.f32.xlu0 %v810_v33  ;;  %v792_v59 = vmul.f32 %v2344_v19, %v769_v53  ;;  %v771_v61 = vmax.f32 %v755_v36, 0.0  ;;  %v757_v57 = vadd.f32 %v2336_v60, %v734_v39  ;;  %v819_v41 = vsel %vm358_vm0, %v789_v54, 0.0 }
 0x16e   : > { %814 = vadd.xlane.f32.xlu1 %v813_v48  ;;  %v793_v62 = vmul.f32 %v2344_v19, %v770_v55  ;;  %v772_v63 = vmax.f32 %v756_v40, 0.0  ;;  %v758_v37 = vadd.f32 %v2336_v60, %v735_v56 }
 0x16f   : > { %v828_v58 = vsel %vm358_vm0, %v792_v59, 0.0  ;;  %v794_v38 = vmul.f32 %v2344_v19, %v771_v61  ;;  %v773_v0 = vmax.f32 %v757_v57, 0.0 }
 0x170   : > { %v831_v1 = vsel %vm358_vm0, %v793_v62, 0.0  ;;  %v795_v2 = vmul.f32 %v2344_v19, %v772_v63  ;;  %v774_v4 = vmax.f32 %v758_v37, 0.0 }
 0x171   : > { %823 = vadd.xlane.f32.xlu0 %v822_v51  ;;  %v834_v6 = vsel %vm358_vm0, %v794_v38, 0.0  ;;  %v796_v52 = vmul.f32 %v2344_v19, %v773_v0 }
 0x172   : > { %826 = vadd.xlane.f32.xlu1 %v825_v42  ;;  %v837_v60 = vsel %vm358_vm0, %v795_v2, 0.0  ;;  %v797_v9 = vmul.f32 %v2344_v19, %v774_v4  ;;  %v863_v19 = vand.u32 127, %v635_v29 }
 0x173   : > { %v840_v13 = vsel %vm358_vm0, %v796_v52, 0.0 }
 0x174   : > { %v843_v16 = vsel %vm358_vm0, %v797_v9, 0.0  ;;  %v868_v44 = vadd.s32 4294967288, %v863_v19  ;;  %v2427_v49 = vsub.s32 %v863_v19, %v2318_v35 }
 0x175   : > { %817 = vadd.xlane.f32.xlu0 %v816_v32 }
 0x176   : > { %820 = vadd.xlane.f32.xlu1 %v819_v41  ;;  %v2422_v30 = vsub.s32 %v868_v44, %v2318_v35 }
 0x179   : > { %829 = vadd.xlane.f32.xlu0 %v828_v58 }
 0x17a   : > { %832 = vadd.xlane.f32.xlu1 %v831_v1 }
 0x17d   : > { %835 = vadd.xlane.f32.xlu0 %v834_v6 }
 0x17e   : > { %838 = vadd.xlane.f32.xlu1 %v837_v60 }
 0x181   : > { %841 = vadd.xlane.f32.xlu0 %v840_v13 }
 0x182   : > { %844 = vadd.xlane.f32.xlu1 %v843_v16 }
 0x1ee   : > { %v2402_v21 = vpop.xlane.xlu0 %799 }
 0x1ef   : > { %v2404_v27 = vpop.xlane.xlu1 %805  ;;  %v867_v54 = vrot.slane %v2402_v21, %v2427_v49 }
 0x1f0   : > { %v878_v51 = vrot.slane %v2404_v27, %v2427_v49 }
 0x1f2   : > { %v2406_v28 = vpop.xlane.xlu0 %802 }
 0x1f3   : > { %v2408_v34 = vpop.xlane.xlu1 %808  ;;  %v872_v53 = vrot.slane %v2406_v28, %v2422_v30 }
 0x1f4   : > { %v882_v50 = vrot.slane %v2408_v34, %v2422_v30 }
 0x1f5   : > { %v874_v59 = vsel %vm873_vm2, %v872_v53, %v867_v54 }
 0x1f6   : > { %v2410_v31 = vpop.xlane.xlu0 %811  ;;  %v883_v55 = vsel %vm873_vm2, %v882_v50, %v878_v51 }
 0x1f7   : > { %v2412_v33 = vpop.xlane.xlu1 %814  ;;  %v887_v39 = vrot.slane %v2410_v31, %v2427_v49  ;;  %v939_v41 = vsel %vm938_vm3, %v883_v55, %v874_v59 }
 0x1f8   : > { %v891_v29 = vrot.slane %v2412_v33, %v2422_v30 }
 0x1fa   : > { %v2415_v43 = vpop.xlane.xlu0 %823  ;;  %v892_v32 = vsel %vm873_vm2, %v891_v29, %v887_v39  ;;  %v964_v39 = vsub.s32 1, %v2318_v35 }
 0x1fb   : > { %v2417_v45 = vpop.xlane.xlu1 %826  ;;  %v941_v37 = vsel %vm940_vm4, %v892_v32, %v939_v41  ;;  %v905_v0 = vrot.slane %v2415_v43, %v2427_v49  ;;  %v2739_v32 = vsub.s32 5, %v2318_v35 }
 0x1fc   : > { %v909_v62 = vrot.slane %v2417_v45, %v2422_v30 }
 0x1fe   : > { %v2419_v47 = vpop.xlane.xlu0 %817  ;;  %v910_v52 = vsel %vm873_vm2, %v909_v62, %v905_v0  ;;  %v2738_v62 = vsub.s32 6, %v2318_v35 }
 0x1ff   : > { %v2424_v48 = vpop.xlane.xlu1 %820  ;;  %v896_v40 = vrot.slane %v2419_v47, %v2427_v49 }
 0x200   : > { %v900_v36 = vrot.slane %v2424_v48, %v2422_v30 }
 0x202   : > { %v2431_v26 = vpop.xlane.xlu0 %829  ;;  %v901_v61 = vsel %vm873_vm2, %v900_v36, %v896_v40  ;;  %v1989_v36 = vmov 0  }
 0x203   : > { %v2443_v42 = vpop.xlane.xlu1 %832  ;;  %v914_v58 = vrot.slane %v2431_v26, %v2427_v49  ;;  %v943_v1 = vsel %vm942_vm5, %v901_v61, %v941_v37  ;;  %1759 = vset.pattern.permute.xlu0 %v1989_v36  ;;  %1758 = vset.pattern.permute.xlu1 %v1989_v36 }
 0x204   : > { %v918_v57 = vrot.slane %v2443_v42, %v2422_v30  ;;  %v945_v19 = vsel %vm944_vm6, %v910_v52, %v943_v1 }
 0x206   : > { %v2450_v56 = vpop.xlane.xlu0 %835  ;;  %v919_v6 = vsel %vm873_vm2, %v918_v57, %v914_v58  ;;  %v968_v57 = vsub.s32 2, %v2318_v35 }
 0x207   : > { %v2460_v63 = vpop.xlane.xlu1 %838  ;;  %v923_v2 = vrot.slane %v2450_v56, %v2427_v49  ;;  %v947_v44 = vsel %vm946_vm7, %v919_v6, %v945_v19  ;;  %v2740_v6 = vsub.s32 3, %v2318_v35 }
 0x208   : > { %v927_v38 = vrot.slane %v2460_v63, %v2422_v30 }
 0x20a   : > { %v2472_v4 = vpop.xlane.xlu0 %841  ;;  %v928_v9 = vsel %vm873_vm2, %v927_v38, %v923_v2 }
 0x20b   : > { %v2476_v60 = vpop.xlane.xlu1 %844  ;;  %v932_v13 = vrot.slane %v2472_v4, %v2427_v49  ;;  %v949_v29 = vsel %vm948_vm8, %v928_v9, %v947_v44 }
 0x20c   : > { %v936_v16 = vrot.slane %v2476_v60, %v2422_v30 }
 0x20e   : > { %v937_v50 = vsel %vm873_vm2, %v936_v16, %v932_v13 }
 0x20f   : > { %v951_v51 = vsel %vm950_vm9, %v937_v50, %v949_v29 }
 0x210   : > { %v954_v53 = vsel %vm953_vm10, %v951_v51, -inf }
 0x211   : > { %955 = vmax.xlane.f32.xlu0 %v954_v53 }
 0x29a   : > { %v956_v54 = vpop.xlane.xlu0 %955 }
 0x29b   : > { %v961_v55 = vrot.slane %v956_v54, %v2328_v46  ;;  %v965_v40 = vrot.slane %v956_v54, %v964_v39  ;;  %v2501_v37 = vrot.slane %v956_v54, %v2739_v32  ;;  %v969_v0 = vrot.slane %v956_v54, %v968_v57 }
 0x29c   : > { %v973_v19 = vrot.slane %v956_v54, %v2740_v6 }
 0x29d   : > { %v998_v59 = vsub.f32 %v2402_v21, %v961_v55  ;;  %v999_v61 = vsub.f32 %v2406_v28, %v961_v55  ;;  %v1000_v41 = vsub.f32 %v2404_v27, %v965_v40  ;;  %v1001_v1 = vsub.f32 %v2408_v34, %v965_v40 }
 0x29e   : > { %v988_v28 = vsub.s32 7, %v2318_v35  ;;  %v985_v27 = vrot.slane %v956_v54, %v2738_v62  ;;  %v1008_v2 = vsub.f32 %v2431_v26, %v2501_v37  ;;  %v1002_v52 = vsub.f32 %v2410_v31, %v969_v0 }
 0x29f   : > { %v1014_v58 = vmul.f32 1.442695, %v998_v59  ;;  %v1016_v38 = vmul.f32 1.442695, %v999_v61  ;;  %v1018_v21 = vmul.f32 1.442695, %v1000_v41  ;;  %v1003_v44 = vsub.f32 %v2412_v33, %v969_v0 }
 0x2a0   : > { %v1020_v9 = vmul.f32 1.442695, %v1001_v1  ;;  %v989_v34 = vrot.slane %v956_v54, %v988_v28  ;;  %v1010_v13 = vsub.f32 %v2450_v56, %v985_v27  ;;  %v1034_v16 = vmul.f32 1.442695, %v1008_v2 }
 0x2a1   : > { %1760 = vpow2.f32 %v1014_v58  ;;  %v1022_v50 = vmul.f32 1.442695, %v1002_v52  ;;  %v976_v31 = vsub.s32 4, %v2318_v35  ;;  %v1004_v51 = vsub.f32 %v2419_v47, %v973_v19 }
 0x2a2   : > { %1762 = vpow2.f32 %v1016_v38  ;;  %v1012_v26 = vsub.f32 %v2472_v4, %v989_v34  ;;  %v1038_v29 = vmul.f32 1.442695, %v1010_v13  ;;  %v1024_v53 = vmul.f32 1.442695, %v1003_v44 }
 0x2a3   : > { %1764 = vpow2.f32 %v1018_v21  ;;  %v977_v33 = vrot.slane %v956_v54, %v976_v31  ;;  %v1005_v4 = vsub.f32 %v2424_v48, %v973_v19  ;;  %v1026_v40 = vmul.f32 1.442695, %v1004_v51 }
 0x2a4   : > { %1766 = vpow2.f32 %v1020_v9  ;;  %v1042_v55 = vmul.f32 1.442695, %v1012_v26  ;;  %v1011_v2 = vsub.f32 %v2460_v63, %v985_v27 }
 0x2a5   : > { %1768 = vpow2.f32 %v1034_v16  ;;  %v1006_v59 = vsub.f32 %v2415_v43, %v977_v33  ;;  %v1028_v61 = vmul.f32 1.442695, %v1005_v4  ;;  %v1007_v54 = vsub.f32 %v2417_v45, %v977_v33 }
 0x2a6   : > { %1770 = vpow2.f32 %v1022_v50  ;;  %v1009_v43 = vsub.f32 %v2443_v42, %v2501_v37  ;;  %v1013_v42 = vsub.f32 %v2476_v60, %v989_v34  ;;  %v1040_v37 = vmul.f32 1.442695, %v1011_v2 }
 0x2a7   : > { %1772 = vpow2.f32 %v1038_v29  ;;  %v1030_v48 = vmul.f32 1.442695, %v1006_v59  ;;  %v1032_v1 = vmul.f32 1.442695, %v1007_v54 }
 0x2a8   : > { %1774 = vpow2.f32 %v1024_v53  ;;  %v1036_v52 = vmul.f32 1.442695, %v1009_v43  ;;  %v1044_v16 = vmul.f32 1.442695, %v1013_v42 }
 0x2a9   : > { %1776 = vpow2.f32 %v1042_v55 }
 0x2aa   : > { %1778 = vpow2.f32 %v1026_v40 }
 0x2ab   : > { %1780 = vpow2.f32 %v1028_v61 }
 0x2ac   : > { %1782 = vpow2.f32 %v1030_v48 }
 0x2ad   : > { %1784 = vpow2.f32 %v1032_v1 }
 0x2ae   : > { %v2522_v36 = vpop.eup %1760  ;;  %1786 = vpow2.f32 %v1036_v52 }
 0x2af   : > { %v2524_v56 = vpop.eup %1762  ;;  %1063 = vperm.xlu1 %1758, %v2522_v36   ;;  %1788 = vpow2.f32 %v1040_v37 }
 0x2b0   : > { %1066 = vperm.xlu0 %1759, %v2524_v56   ;;  %v2531_v47 = vpop.eup %1764  ;;  %1790 = vpow2.f32 %v1044_v16 }
 0x2b1   : > { %v2535_v41 = vpop.eup %1766 }
 0x2b2   : > { %v2538_v58 = vpop.eup %1768 }
 0x2b3   : > { %1069 = vperm.xlu1 %1758, %v2531_v47   ;;  %v2542_v38 = vpop.eup %1770 }
 0x2b4   : > { %1093 = vperm.xlu0 %1759, %v2538_v58   ;;  %v2545_v0 = vpop.eup %1772 }
 0x2b5   : > { %v2550_v21 = vpop.eup %1774 }
 0x2b6   : > { %v2553_v45 = vpop.eup %1776 }
 0x2b7   : > { %1072 = vperm.xlu1 %1758, %v2535_v41   ;;  %v2557_v9 = vpop.eup %1778 }
 0x2b8   : > { %1099 = vperm.xlu0 %1759, %v2545_v0   ;;  %v2561_v13 = vpop.eup %1780 }
 0x2b9   : > { %v2564_v19 = vpop.eup %1782 }
 0x2ba   : > { %v2567_v63 = vpop.eup %1784 }
 0x2bb   : > { %1075 = vperm.xlu1 %1758, %v2542_v38   ;;  %v2570_v27 = vpop.eup %1786 }
 0x2bc   : > { %1105 = vperm.xlu0 %1759, %v2553_v45   ;;  %v2573_v60 = vpop.eup %1788 }
 0x2bd   : > { %v2576_v34 = vpop.eup %1790 }
 0x2bf   : > { %1078 = vperm.xlu1 %1758, %v2550_v21  }
 0x2c3   : > { %1081 = vperm.xlu1 %1758, %v2557_v9  }
 0x2c7   : > { %1084 = vperm.xlu1 %1758, %v2561_v13  }
 0x2cb   : > { %1087 = vperm.xlu1 %1758, %v2564_v19  }
 0x2cf   : > { %1090 = vperm.xlu1 %1758, %v2567_v63  }
 0x2d3   : > { %1096 = vperm.xlu1 %1758, %v2570_v27  }
 0x2d7   : > { %1102 = vperm.xlu1 %1758, %v2573_v60  }
 0x2db   : > { %1108 = vperm.xlu1 %1758, %v2576_v34  }
 0x32a   : > { %v1064_v44 = vpop.permute.xlu1 %1063 }
 0x32b   : > { %v1067_v55 = vpop.permute.xlu0 %1066  ;;  %v1113_v2 = vrot.slane %v1064_v44, %v2427_v49 }
 0x32c   : > { %v1117_v1 = vrot.slane %v1067_v55, %v2422_v30 }
 0x32e   : > { %v1070_v50 = vpop.permute.xlu1 %1069  ;;  %v1118_v44 = vsel %vm873_vm2, %v1117_v1, %v1113_v2 }
 0x32f   : > { %v1094_v40 = vpop.permute.xlu0 %1093  ;;  %v1122_v52 = vrot.slane %v1070_v50, %v2427_v49 }
 0x330   : > { %v1158_v50 = vrot.slane %v1094_v40, %v2427_v49 }
 0x332   : > { %v1073_v26 = vpop.permute.xlu1 %1072 }
 0x333   : > { %v1126_v61 = vrot.slane %v1073_v26, %v2422_v30  ;;  %v1100_v54 = vpop.permute.xlu0 %1099 }
 0x335   : > { %v1127_v62 = vsel %vm873_vm2, %v1126_v61, %v1122_v52 }
 0x336   : > { %v1076_v29 = vpop.permute.xlu1 %1075  ;;  %v1182_v61 = vsel %vm938_vm3, %v1127_v62, %v1118_v44 }
 0x337   : > { %v1131_v37 = vrot.slane %v1076_v29, %v2427_v49 }
 0x33a   : > { %v1079_v51 = vpop.permute.xlu1 %1078 }
 0x33b   : > { %v1135_v48 = vrot.slane %v1079_v51, %v2422_v30 }
 0x33d   : > { %v1136_v51 = vsel %vm873_vm2, %v1135_v48, %v1131_v37 }
 0x33e   : > { %v1082_v53 = vpop.permute.xlu1 %1081  ;;  %v1183_v48 = vsel %vm940_vm4, %v1136_v51, %v1182_v61 }
 0x33f   : > { %v1140_v26 = vrot.slane %v1082_v53, %v2427_v49  ;;  %v1106_v53 = vpop.permute.xlu0 %1105 }
 0x340   : > { %v1176_v2 = vrot.slane %v1106_v53, %v2427_v49  ;;  %v2766_v53 = vsub.s32 6, %v2318_v35 }
 0x342   : > { %v1085_v33 = vpop.permute.xlu1 %1084 }
 0x343   : > { %v1144_v42 = vrot.slane %v1085_v33, %v2422_v30 }
 0x345   : > { %v1145_v33 = vsel %vm873_vm2, %v1144_v42, %v1140_v26 }
 0x346   : > { %v1088_v4 = vpop.permute.xlu1 %1087  ;;  %v1184_v52 = vsel %vm942_vm5, %v1145_v33, %v1183_v48 }
 0x347   : > { %v1149_v55 = vrot.slane %v1088_v4, %v2427_v49 }
 0x34a   : > { %v1091_v59 = vpop.permute.xlu1 %1090 }
 0x34b   : > { %v1153_v16 = vrot.slane %v1091_v59, %v2422_v30  ;;  %v1167_v59 = vrot.slane %v1100_v54, %v2427_v49 }
 0x34e   : > { %v1097_v43 = vpop.permute.xlu1 %1096 }
 0x34f   : > { %v1162_v32 = vrot.slane %v1097_v43, %v2422_v30  ;;  %v1154_v43 = vsel %vm873_vm2, %v1153_v16, %v1149_v55 }
 0x351   : > { %v1163_v4 = vsel %vm873_vm2, %v1162_v32, %v1158_v50 }
 0x352   : > { %v1103_v6 = vpop.permute.xlu1 %1102 }
 0x353   : > { %v1171_v29 = vrot.slane %v1103_v6, %v2422_v30  ;;  %v1185_v6 = vsel %vm944_vm6, %v1154_v43, %v1184_v52 }
 0x354   : > { %v1186_v62 = vsel %vm946_vm7, %v1163_v4, %v1185_v6 }
 0x355   : > { %v1172_v1 = vsel %vm873_vm2, %v1171_v29, %v1167_v59 }
 0x356   : > { %v1109_v40 = vpop.permute.xlu1 %1108  ;;  %v1187_v37 = vsel %vm948_vm8, %v1172_v1, %v1186_v62 }
 0x357   : > { %v1180_v54 = vrot.slane %v1109_v40, %v2422_v30 }
 0x359   : > { %v1181_v42 = vsel %vm873_vm2, %v1180_v54, %v1176_v2 }
 0x35a   : > { %v1188_v16 = vsel %vm950_vm9, %v1181_v42, %v1187_v37 }
 0x35b   : > { %v1190_v32 = vsel %vm953_vm10, %v1188_v16, 0.0 }
 0x35c   : > { %1191 = vadd.xlane.f32.xlu0 %v1190_v32 }
 0x3e5   : > { %v1192_v26 = vpop.xlane.xlu0 %1191 }
 0x3e6   : > { %1792 = vrcp.f32 %v1192_v26 }
 0x3f3   : > { %v1793_v51 = vpop.eup %1792 }
 0x3f4   : > { %v1214_v49 = vrot.slane %v1793_v51, %v976_v31  ;;  %v1198_v55 = vrot.slane %v1793_v51, %v2328_v46  ;;  %v1226_v50 = vrot.slane %v1793_v51, %v988_v28  ;;  %v1202_v59 = vrot.slane %v1793_v51, %v964_v39 }
 0x3f5   : > { %v1222_v43 = vrot.slane %v1793_v51, %v2766_v53 }
 0x3f6   : > { %v1243_v30 = vmul.f32 %v2564_v19, %v1214_v49  ;;  %v1235_v44 = vmul.f32 %v2522_v36, %v1198_v55  ;;  %v1249_v33 = vmul.f32 %v2553_v45, %v1226_v50  ;;  %v1236_v29 = vmul.f32 %v2524_v56, %v1198_v55 }
 0x3f7   : > { %v1237_v46 = vmul.f32 %v2531_v47, %v1202_v59  ;;  %v1238_v31 = vmul.f32 %v2535_v41, %v1202_v59  ;;  %v1206_v36 = vrot.slane %v1793_v51, %v968_v57  ;;  %v2764_v56 = vsub.s32 3, %v2318_v35 }
 0x3f8   : > { %1293 = vperm.xlu0 %1759, %v1243_v30   ;;  %1253 = vperm.xlu1 %1758, %v1235_v44   ;;  %v1244_v41 = vmul.f32 %v2567_v63, %v1214_v49  ;;  %v2765_v57 = vsub.s32 5, %v2318_v35  ;;  %v1250_v63 = vmul.f32 %v2576_v34, %v1226_v50 }
 0x3f9   : > { %v1239_v28 = vmul.f32 %v2542_v38, %v1206_v36  ;;  %v1240_v45 = vmul.f32 %v2550_v21, %v1206_v36  ;;  %v1210_v19 = vrot.slane %v1793_v51, %v2764_v56 }
 0x3fa   : > { %v1218_v61 = vrot.slane %v1793_v51, %v2765_v57 }
 0x3fb   : > { %v1241_v39 = vmul.f32 %v2557_v9, %v1210_v19  ;;  %v1242_v47 = vmul.f32 %v2561_v13, %v1210_v19  ;;  %v1247_v9 = vmul.f32 %v2545_v0, %v1222_v43  ;;  %v1248_v13 = vmul.f32 %v2573_v60, %v1222_v43 }
 0x3fc   : > { %1323 = vperm.xlu0 %1759, %v1249_v33   ;;  %1258 = vperm.xlu1 %1758, %v1236_v29   ;;  %v1245_v38 = vmul.f32 %v2538_v58, %v1218_v61  ;;  %v1246_v21 = vmul.f32 %v2570_v27, %v1218_v61 }
 0x400   : > { %1263 = vperm.xlu1 %1758, %v1237_v46  }
 0x404   : > { %1268 = vperm.xlu1 %1758, %v1238_v31  }
 0x408   : > { %1273 = vperm.xlu1 %1758, %v1239_v28  }
 0x40c   : > { %1278 = vperm.xlu1 %1758, %v1240_v45  }
 0x410   : > { %1283 = vperm.xlu1 %1758, %v1241_v39  }
 0x414   : > { %1288 = vperm.xlu1 %1758, %v1242_v47  }
 0x418   : > { %1298 = vperm.xlu1 %1758, %v1244_v41  }
 0x41c   : > { %1303 = vperm.xlu1 %1758, %v1245_v38  }
 0x420   : > { %1308 = vperm.xlu1 %1758, %v1246_v21  }
 0x424   : > { %1313 = vperm.xlu1 %1758, %v1247_v9  }
 0x428   : > { %1318 = vperm.xlu1 %1758, %v1248_v13  }
 0x42c   : > { %1328 = vperm.xlu1 %1758, %v1250_v63  }
 0x473   : > { %v1254_v48 = vpop.permute.xlu1 %1253  ;;  %v1294_v0 = vpop.permute.xlu0 %1293 }
 0x474   : > { %v1331_v37 = vmul.f32 %v1254_v48, %v2238_v7 }
 0x477   : > { %v1259_v4 = vpop.permute.xlu1 %1258  ;;  %v1324_v43 = vpop.permute.xlu0 %1323 }
 0x478   : > { %v1332_v54 = vmul.f32 %v1259_v4, %v2246_v10 }
 0x47a   : > { %v1348_v10 = vsel %vm358_vm0, %v1332_v54, 0.0 }
 0x47b   : > { %v1264_v52 = vpop.permute.xlu1 %1263 }
 0x47c   : > { %v1333_v60 = vmul.f32 %v1264_v52, %v2252_v12 }
 0x47e   : > { %v1356_v12 = vsel %vm358_vm0, %v1333_v60, 0.0 }
 0x47f   : > { %v1269_v58 = vpop.permute.xlu1 %1268 }
 0x480   : > { %v1334_v35 = vmul.f32 %v1269_v58, %v2268_v15  ;;  %v1345_v58 = vmul.f32 %v1324_v43, %v2259_v14 }
 0x482   : > { %v1357_v16 = vsel %vm358_vm0, %v1334_v35, 0.0 }
 0x483   : > { %v1274_v1 = vpop.permute.xlu1 %1273 }
 0x484   : > { %v1335_v62 = vmul.f32 %v1274_v1, %v2276_v18  ;;  %v1358_v18 = vadd.f32 %v1357_v16, %v1356_v12 }
 0x486   : > { %v1365_v51 = vsel %vm358_vm0, %v1335_v62, 0.0  ;;  %v1359_v29 = vrot.slane %v1358_v18, 4 }
 0x487   : > { %v1279_v40 = vpop.permute.xlu1 %1278 }
 0x488   : > { %v1336_v6 = vmul.f32 %v1279_v40, %v2283_v20  ;;  %v1339_v20 = vmul.f32 %v1294_v0, %v2300_v24  ;;  %v1360_v39 = vadd.f32 %v1359_v29, %v1358_v18 }
 0x48a   : > { %v1366_v26 = vsel %vm358_vm0, %v1336_v6, 0.0  ;;  %v1383_v24 = vsel %vm358_vm0, %v1339_v20, 0.0  ;;  %v1361_v9 = vrot.slane %v1360_v39, 2 }
 0x48b   : > { %v1284_v27 = vpop.permute.xlu1 %1283  ;;  %v1367_v55 = vadd.f32 %v1366_v26, %v1365_v51 }
 0x48c   : > { %v1337_v32 = vmul.f32 %v1284_v27, %v2289_v22  ;;  %v1347_v22 = vsel %vm358_vm0, %v1331_v37, 0.0 }
 0x48d   : > { %v1349_v30 = vadd.f32 %v1348_v10, %v1347_v22  ;;  %v1368_v46 = vrot.slane %v1367_v55, 4 }
 0x48f   : > { %v1289_v2 = vpop.permute.xlu1 %1288  ;;  %v1350_v36 = vrot.slane %v1349_v30, 4  ;;  %v1369_v57 = vadd.f32 %v1368_v46, %v1367_v55 }
 0x490   : > { %v1338_v34 = vmul.f32 %v1289_v2, %v2297_v23  ;;  %v1362_v2 = vadd.f32 %v1361_v9, %v1360_v39 }
 0x491   : > { %v1351_v61 = vadd.f32 %v1350_v36, %v1349_v30  ;;  %v1370_v63 = vrot.slane %v1369_v57, 2 }
 0x492   : > { %v1375_v23 = vsel %vm358_vm0, %v1338_v34, 0.0  ;;  %v1363_v37 = vrot.slane %v1362_v2, 1 }
 0x493   : > { %v1299_v42 = vpop.permute.xlu1 %1298  ;;  %v1352_v4 = vrot.slane %v1351_v61, 2  ;;  %v1371_v0 = vadd.f32 %v1370_v63, %v1369_v57 }
 0x494   : > { %v1340_v15 = vmul.f32 %v1299_v42, %v2307_v25  ;;  %v1374_v25 = vsel %vm358_vm0, %v1337_v32, 0.0  ;;  %v1364_v51 = vadd.f32 %v1363_v37, %v1362_v2 }
 0x495   : > { %v1376_v44 = vadd.f32 %v1375_v23, %v1374_v25  ;;  %v1353_v60 = vadd.f32 %v1352_v4, %v1351_v61  ;;  %v1372_v20 = vrot.slane %v1371_v0, 1 }
 0x496   : > { %v1384_v7 = vsel %vm358_vm0, %v1340_v15, 0.0 }
 0x497   : > { %v1304_v49 = vpop.permute.xlu1 %1303  ;;  %v1385_v50 = vadd.f32 %v1384_v7, %v1383_v24  ;;  %v1377_v28 = vrot.slane %v1376_v44, 4  ;;  %v1354_v26 = vrot.slane %v1353_v60, 1  ;;  %v1373_v22 = vadd.f32 %v1372_v20, %v1371_v0 }
 0x498   : > { %v1341_v33 = vmul.f32 %v1304_v49, %v2230_v3 }
 0x499   : > { %v1386_v45 = vrot.slane %v1385_v50, 4  ;;  %v1378_v38 = vadd.f32 %v1377_v28, %v1376_v44  ;;  %v1355_v55 = vadd.f32 %v1354_v26, %v1353_v60 }
 0x49a   : > { %v1392_v56 = vsel %vm358_vm0, %v1341_v33, 0.0 }
 0x49b   : > { %v1309_v59 = vpop.permute.xlu1 %1308  ;;  %v1387_v3 = vadd.f32 %v1386_v45, %v1385_v50  ;;  %v1379_v52 = vrot.slane %v1378_v38, 2  ;;  %v1427_v50 = vsel %vm938_vm3, %v1364_v51, %v1355_v55 }
 0x49c   : > { %v1342_v31 = vmul.f32 %v1309_v59, %v2235_v5  ;;  %v1428_v59 = vsel %vm940_vm4, %v1373_v22, %v1427_v50 }
 0x49d   : > { %v1388_v1 = vrot.slane %v1387_v3, 2  ;;  %v1380_v34 = vadd.f32 %v1379_v52, %v1378_v38 }
 0x49e   : > { %v1393_v19 = vsel %vm358_vm0, %v1342_v31, 0.0 }
 0x49f   : > { %v1394_v47 = vadd.f32 %v1393_v19, %v1392_v56  ;;  %v1314_v41 = vpop.permute.xlu1 %1313  ;;  %v1389_v42 = vadd.f32 %v1388_v1, %v1387_v3  ;;  %v1381_v10 = vrot.slane %v1380_v34, 1 }
 0x4a0   : > { %v1343_v53 = vmul.f32 %v1314_v41, %v2241_v8 }
 0x4a1   : > { %v1395_v21 = vrot.slane %v1394_v47, 4  ;;  %v1390_v18 = vrot.slane %v1389_v42, 1  ;;  %v1382_v25 = vadd.f32 %v1381_v10, %v1380_v34 }
 0x4a2   : > { %v1401_v40 = vsel %vm358_vm0, %v1343_v53, 0.0 }
 0x4a3   : > { %v1396_v5 = vadd.f32 %v1395_v21, %v1394_v47  ;;  %v1319_v13 = vpop.permute.xlu1 %1318  ;;  %v1391_v44 = vadd.f32 %v1390_v18, %v1389_v42  ;;  %v1429_v31 = vsel %vm942_vm5, %v1382_v25, %v1428_v59 }
 0x4a4   : > { %v1344_v48 = vmul.f32 %v1319_v13, %v2249_v11  ;;  %v1410_v11 = vsel %vm358_vm0, %v1345_v58, 0.0 }
 0x4a5   : > { %v1397_v35 = vrot.slane %v1396_v5, 2  ;;  %v1430_v28 = vsel %vm944_vm6, %v1391_v44, %v1429_v31 }
 0x4a6   : > { %v1402_v27 = vsel %vm358_vm0, %v1344_v48, 0.0 }
 0x4a7   : > { %v1403_v6 = vadd.f32 %v1402_v27, %v1401_v40  ;;  %v1329_v8 = vpop.permute.xlu1 %1328  ;;  %v1398_v16 = vadd.f32 %v1397_v35, %v1396_v5 }
 0x4a8   : > { %v1346_v54 = vmul.f32 %v1329_v8, %v2273_v17 }
 0x4a9   : > { %v1404_v62 = vrot.slane %v1403_v6, 4  ;;  %v1399_v17 = vrot.slane %v1398_v16, 1 }
 0x4aa   : > { %v1411_v14 = vsel %vm358_vm0, %v1346_v54, 0.0 }
 0x4ab   : > { %v1405_v32 = vadd.f32 %v1404_v62, %v1403_v6  ;;  %v1412_v15 = vadd.f32 %v1411_v14, %v1410_v11  ;;  %v1400_v33 = vadd.f32 %v1399_v17, %v1398_v16 }
 0x4ad   : > { %v1406_v12 = vrot.slane %v1405_v32, 2  ;;  %v1413_v23 = vrot.slane %v1412_v15, 4  ;;  %v1431_v45 = vsel %vm946_vm7, %v1400_v33, %v1430_v28 }
 0x4af   : > { %v1407_v7 = vadd.f32 %v1406_v12, %v1405_v32  ;;  %v1414_v49 = vadd.f32 %v1413_v23, %v1412_v15 }
 0x4b1   : > { %v1408_v24 = vrot.slane %v1407_v7, 1  ;;  %v1415_v30 = vrot.slane %v1414_v49, 2 }
 0x4b3   : > { %v1416_v29 = vadd.f32 %v1415_v30, %v1414_v49  ;;  %v1409_v46 = vadd.f32 %v1408_v24, %v1407_v7 }
 0x4b5   : > { %v1417_v36 = vrot.slane %v1416_v29, 1  ;;  %v1432_v19 = vsel %vm948_vm8, %v1409_v46, %v1431_v45 }
 0x4b7   : > { %v1418_v56 = vadd.f32 %v1417_v36, %v1416_v29 }
 0x4b9   : > { %v1433_v39 = vsel %vm950_vm9, %v1418_v56, %v1432_v19 }
 0x4ba   : > { %1435 = vst.msk [vmem:[%s336_s13] sm:$0xff] %vm358_vm0, %v1433_v39 }
 0x4bb   : > { %1915 = shalt.err (!%p1912_p4)
}
 0x4bc   : > { %s1916_s0 = scalar_lea.hbm %s2686_s14, 128  ;;  %s1920_s29 = scalar_lea.hbm %s2731_s6, 256 }
 0x4bd   : > { %p1917_p6 = scmp.ne.s32.totalorder %s2686_s14, %s1916_s0  ;;  %p1921_p2 = scmp.lt.s32.totalorder %s2686_s14, %s2731_s6 }
 0x4be   : > { %p1922_p5 = scmp.lt.s32.totalorder %s1920_s29, %s1916_s0 }
 0x4bf   : > { %p1918_p7 = pnand %p1917_p6, %p2767_p10 }
 0x4c0   : > { %p1923_p12 = por %p1922_p5, %p1921_p2 }
 0x4c1   : > { %p1919_p8 = pneg %p1918_p7 }
 0x4c3   : > { %p1924_p0 = pnand %p1923_p12, %p1919_p8 }
 0x4c5   : > { %1927 = shalt.err (!%p1924_p0)
}
 0x4c6   : > { %1692 = dma.vmem_to_hbm [thread:$0]  (%p2767_p10), %s1451_s8, 128, %s2686_s14, %s1437_s25  }
 0x4c7 PF: > { %s1462_s26 = sand.u32 1, %s1966_s21   ;;  %p2768_p3 = scmp.ne.s32.totalorder %s2745_s28, 0 }
 0x4c8   : > { %p2769_p11 = scmp.ge.s32.totalorder %s1978_s24, 2  ;;  %s1463_s12 = scalar_lea.sflag [#allocation4], %s1462_s26 }
 0x4ca   : > { %p1709_p9 = pnand %p2769_p11, %p2768_p3 }
 0x4cc   : > { %p1710_p13 = pneg %p1709_p9 }
 0x4ce   : > { %1961 = dma.done.wait (%p1710_p13), %s1463_s12, 128  }
 0x4cf   : > { %1963 = vsyncadd (%p1710_p13), %s1463_s12, 4294967168  ;;  %s2770_s15 = sld [smem:[#allocation16_spill]]  ;;  %p23_p1 = scmp.ge.s32.totalorder %s2104_s19, 4  }
 0x4d0   : > { %s2771_s21 = smov %s1970_s22  ;;  %s2772_s22 = smov %s1974_s23 }
 0x4d1   : > { %s2774_s24 = smov %s2104_s19  ;;  %25 = sbr.rel (!%p23_p1) target bundleno = 12 (0xc), region = 110 }
 0x4d5   : > { %s2773_s23 = smov %s2770_s15 }
 0x4d6   :  { %1468 = vsyncpa [#allocation3], 1 }
 0x4d7   :  { %1470 = vsyncpa [#allocation3 + $0x1], 1 }
 0x4d8   :  { %1471 = vsyncpa [#allocation6], 1 }
 0x4d9   :  { %1473 = vsyncpa [#allocation6 + $0x1], 1 }
 0x4da   :  { %1474 = vsyncpa [#allocation9], 1 }
 0x4db   :  { %1475 = vsyncpa [#allocation4], 1 }
 0x4dc   :  { %1477 = vsyncpa [#allocation4 + $0x1], 1 }

</bundles_post_ra>
